<compile_context>
chip_gen: v5e
topology: v5e:2x2
jax: 0.10.0
libtpu: 0.0.40
codegen_flags: <defaults>
</compile_context>

<pallas_src>
import functools

import jax
import jax.numpy as jnp
from jax.experimental import pallas as pl
from jax.experimental.pallas import tpu as pltpu

IN_FEATURES = 10
OUT_FEATURES = 2
DEFAULT_TILE_B = 8192  # rows per grid step (multiple of 128 when tiling)


def linear_kernel(x_ref, w_ref, b_ref, o_ref):
    """One batch tile of y^T = W @ x^T + b.

    x_ref: (TILE_B, IN)  f32  -- batch tile in its native row-major layout
    w_ref: (OUT, IN)     f32  -- PyTorch nn.Linear weight layout, VMEM-resident
    b_ref: (OUT, 1)      f32  -- VMEM-resident
    o_ref: (OUT, TILE_B) f32  -- lane-dense output tile (full-lane stores)
    """
    y_t = jnp.dot(
        w_ref[...],
        x_ref[...].T,  # transpose handled on-chip (MXU/XLU slots), no HBM pass
        preferred_element_type=jnp.float32,
        precision=jax.lax.Precision.HIGHEST,  # f32-faithful (nn.Linear semantics)
    )
    o_ref[...] = (y_t + b_ref[...]).astype(o_ref.dtype)


def _round_up(n, m):
    return ((n + m - 1) // m) * m


@functools.partial(jax.jit, static_argnames=("tile_b",))
def simple_model_forward(x, w, b, *, tile_b=DEFAULT_TILE_B):
    """y = x @ w.T + b, matching nn.Linear(10, 2).forward.

    x: (B, 10) f32, w: (2, 10) f32 (PyTorch layout), b: (2,) f32 -> (B, 2) f32.
    """
    B = x.shape[0]
    x = x.astype(jnp.float32)  # no-op for f32 inputs; no bf16 wrapper cast
    w = w.astype(jnp.float32)
    b2 = b.reshape(OUT_FEATURES, 1).astype(jnp.float32)

    if B <= tile_b:
        # Single full-extent block: block dims == array dims, so no (8, 128)
        # alignment requirement and no padding anywhere.
        tile = B
        grid = (1,)
    else:
        # Lane axis of the (OUT, tile) output block must be a multiple of 128.
        # Ragged last block (B % tile != 0) is handled by Pallas: the partial
        # block's out-of-range writeback is masked, no jnp.pad needed.
        tile = _round_up(min(tile_b, B), 128)
        grid = (pl.cdiv(B, tile),)

    bytes_accessed = (
        B * IN_FEATURES * 4
        + OUT_FEATURES * IN_FEATURES * 4
        + OUT_FEATURES * 4
        + B * OUT_FEATURES * 4
    )
    cost = pl.CostEstimate(
        flops=2 * B * IN_FEATURES * OUT_FEATURES,
        transcendentals=0,
        bytes_accessed=bytes_accessed,
    )

    y_t = pl.pallas_call(
        linear_kernel,
        out_shape=jax.ShapeDtypeStruct((OUT_FEATURES, B), jnp.float32),
        grid_spec=pl.GridSpec(
            grid=grid,
            in_specs=[
                # x: one batch tile per grid step (mem-dominant array).
                pl.BlockSpec((tile, IN_FEATURES), lambda i: (i, 0)),
                # W, b: constant index_map -> resident in VMEM across steps.
                pl.BlockSpec((OUT_FEATURES, IN_FEATURES), lambda i: (0, 0)),
                pl.BlockSpec((OUT_FEATURES, 1), lambda i: (0, 0)),
            ],
            # Lane-dense output blocks: last dim is the batch (128-aligned when
            # tiled), so stores are unmasked full-lane vst.
            out_specs=pl.BlockSpec((OUT_FEATURES, tile), lambda i: (0, i)),
        ),
        compiler_params=pltpu.CompilerParams(
            # Independent batch tiles -> shard across TCs on v7x megacore.
            dimension_semantics=("parallel",),
            # Headroom for large tiles even on v5e's 16 MiB scoped default;
            # well below v7x's 64 MiB physical VMEM.
            vmem_limit_bytes=32 * 1024 * 1024,
        ),
        cost_estimate=cost,
    )(x, w, b2)

    # Result is produced lane-dense as (OUT, B); transposing the tiny output
    # back to the module's (B, OUT) costs ~8 B/row. Consumers that can take
    # (OUT, B) directly should use y_t as-is.
    return y_t.T


if __name__ == "__main__":
    key = jax.random.PRNGKey(0)
    kx, kw, kb = jax.random.split(key, 3)

    # nn.Linear(10, 2) init: U(-1/sqrt(in), 1/sqrt(in)); weight stored (OUT, IN).
    bound = 1.0 / (IN_FEATURES ** 0.5)
    w = jax.random.uniform(
        kw, (OUT_FEATURES, IN_FEATURES), jnp.float32, minval=-bound, maxval=bound
    )
    b = jax.random.uniform(
        kb, (OUT_FEATURES,), jnp.float32, minval=-bound, maxval=bound
    )

    def reference(xv):
        # Exact-f32 reference (VPU elementwise mul + sum; no matmul-precision
        # ambiguity), matching the PyTorch module's math.
        return (xv[:, None, :] * w[None, :, :]).sum(axis=-1) + b[None, :]

    # Small batch (natural module usage): single full-extent block, grid=(1,).
    B1 = 8
    x1 = jax.random.normal(kx, (B1, IN_FEATURES), jnp.float32)
    y1 = simple_model_forward(x1, w, b)
    jax.block_until_ready(y1)
    assert y1.shape == (B1, OUT_FEATURES)
    assert jnp.allclose(y1, reference(x1), atol=1e-4, rtol=1e-4)

    # Tiled + ragged path: B not a multiple of the tile (replaces the old
    # jnp.pad; Pallas masks the partial last block's writeback).
    B2 = 300
    x2 = jax.random.normal(jax.random.PRNGKey(1), (B2, IN_FEATURES), jnp.float32)
    y2 = simple_model_forward(x2, w, b, tile_b=128)
    jax.block_until_ready(y2)
    assert y2.shape == (B2, OUT_FEATURES)
    assert jnp.allclose(y2, reference(x2), atol=1e-4, rtol=1e-4)

    print("KERNEL_OK")
</pallas_src>

<mosaic_0001>
module attributes {stable_mosaic.version = 11 : i64} {
  func.func @linear_kernel(%arg0: i32, %arg1: memref<8x10xf32, #tpu.memory_space<vmem>>, %arg2: memref<2x10xf32, #tpu.memory_space<vmem>>, %arg3: memref<2x1xf32, #tpu.memory_space<vmem>>, %arg4: memref<2x8xf32, #tpu.memory_space<vmem>>) attributes {dimension_semantics = [#tpu.dimension_semantics<parallel>], iteration_bounds = array<i64: 1>, scalar_prefetch = 0 : i64, scratch_operands = 0 : i64, tpu.core_type = #tpu.core_type<tc>, window_params = [{transform_indices = @transform_0, window_bounds = array<i64: 8, 10>}, {pipeline_mode = #tpu.pipeline_mode<synchronous>, transform_indices = @transform_1, window_bounds = array<i64: 2, 10>}, {pipeline_mode = #tpu.pipeline_mode<synchronous>, transform_indices = @transform_2, window_bounds = array<i64: 2, 1>}, {transform_indices = @transform_3, window_bounds = array<i64: 2, 8>}]} {
    %c0 = arith.constant 0 : index
    %c0_0 = arith.constant 0 : index
    %0 = vector.load %arg2[%c0, %c0_0] : memref<2x10xf32, #tpu.memory_space<vmem>>, vector<2x10xf32>
    %c0_1 = arith.constant 0 : index
    %c0_2 = arith.constant 0 : index
    %1 = vector.load %arg1[%c0_1, %c0_2] : memref<8x10xf32, #tpu.memory_space<vmem>>, vector<8x10xf32>
    %2 = tpu.transpose %1, [1, 0] : vector<8x10xf32> -> vector<10x8xf32>
    %cst = arith.constant dense<0.000000e+00> : vector<2x8xf32>
    %3 = tpu.matmul %0, %2, %cst {dimension_numbers = #tpu.dot_dimension_numbers<[1], [0], [0], [1], [0, 0, 1, 1], [], []>, precision = #tpu.contract_precision<fp32>} : vector<2x10xf32>, vector<10x8xf32>, vector<2x8xf32> -> vector<2x8xf32>
    %c0_3 = arith.constant 0 : index
    %c0_4 = arith.constant 0 : index
    %4 = vector.load %arg3[%c0_3, %c0_4] : memref<2x1xf32, #tpu.memory_space<vmem>>, vector<2x1xf32>
    %5 = vector.broadcast %4 : vector<2x1xf32> to vector<2x8xf32>
    %6 = arith.addf %3, %5 : vector<2x8xf32>
    %c0_5 = arith.constant 0 : index
    %c0_6 = arith.constant 0 : index
    %7 = vector.load %arg4[%c0_5, %c0_6] : memref<2x8xf32, #tpu.memory_space<vmem>>, vector<2x8xf32>
    tpu.vector_store %arg4[%c0_5, %c0_6], %6 {strides = array<i32>} : memref<2x8xf32, #tpu.memory_space<vmem>>, vector<2x8xf32>,
    return
  }
  func.func @transform_0(%arg0: i32) -> (i32, i32) {
    %c0_i32 = arith.constant 0 : i32
    %c0_i32_0 = arith.constant 0 : i32
    return %arg0, %c0_i32 : i32, i32
  }
  func.func @transform_1(%arg0: i32) -> (i32, i32) {
    %c0_i32 = arith.constant 0 : i32
    %c0_i32_0 = arith.constant 0 : i32
    %c0_i32_1 = arith.constant 0 : i32
    return %c0_i32, %c0_i32_0 : i32, i32
  }
  func.func @transform_2(%arg0: i32) -> (i32, i32) {
    %c0_i32 = arith.constant 0 : i32
    %c0_i32_0 = arith.constant 0 : i32
    %c0_i32_1 = arith.constant 0 : i32
    return %c0_i32, %c0_i32_0 : i32, i32
  }
  func.func @transform_3(%arg0: i32) -> (i32, i32) {
    %c0_i32 = arith.constant 0 : i32
    %c0_i32_0 = arith.constant 0 : i32
    return %c0_i32, %arg0 : i32, i32
  }
}

</mosaic_0001>

<bundles_post_ra>
// kernel: simple_model_forward.1
= control target key start
LH: loop header
LB: loop body
LE: loop exit
PB: predicated region body
PF: predicated region fallthrough
CT: control target
= control target key end

     0   :  { %8 = vsyncpa [#allocation3], 0  ;;  %s300_s0 = inlined_call_operand.hbm [shape: f32[8,10], index: 0, kind: input, shape index: {}]   ;;  %s301_s1 = inlined_call_operand.vmem [shape: f32[2,10], index: 1, kind: input, shape index: {}]   ;;  %s302_s2 = inlined_call_operand.vmem [shape: f32[2,1], index: 2, kind: input, shape index: {}]   ;;  %s303_s3 = inlined_call_operand.hbm [shape: f32[2,8], index: 3, kind: output, shape index: {}]  }
   0x1   :  { %9 = vsyncpa [#allocation4], 0  ;;  %s15_s14 = sshll.u32 %s300_s0, 4  ;;  %s265_s15 = smov [#allocation2]   ;;  %s16_s14 = int_to_ptr.hbm [resolvable:$true] %s15_s14 }
   0x2   :  { %s17_s16 = sshll.u32 %s265_s15, 4  ;;  %s18_s16 = int_to_ptr.vmem [resolvable:$true] %s17_s16 }
   0x3   :  { %20 = dma.hbm_to_vmem [thread:$0]  %s16_s14, 128, %s18_s16, [#allocation3]  }
   0x4   :  { %261 = dma.done.wait [#allocation3], 128  }
   0x5   :  { %262 = vsyncadd [#allocation3], 4294967168  ;;  %v266_v0 = vmov 0   ;;  %vm37_vm0 = vcmask 80896   ;;  %v30_v1 = vld [vmem:[#allocation2] sm:$0xff]  ;;  %s267_s0 = smov [#allocation5]  }
   0x6   :  { %212 = vset.pattern.permute.xlu0 %v266_v0  ;;  %v29_v2 = vld [vmem:[%s301_s1] sm:$0x3]  ;;  %v42_v4 = vsel %vm37_vm0, %v30_v1, 0  ;;  %s197_s1 = sshll.u32 %s267_s0, 4  ;;  %s199_s22 = sshll.u32 %s303_s3, 4  ;;  %vm190_vm1 = vcmask 58368   ;;  %s198_s1 = int_to_ptr.vmem [resolvable:$true] %s197_s1  ;;  %s200_s22 = int_to_ptr.hbm [resolvable:$true] %s199_s22 }
   0x7   :  { %v31_v3 = vld [vmem:[%s302_s2] sm:$0x3]  ;;  %v39_v5 = vsel %vm37_vm0, %v29_v2, 0  ;;  %v59_v6 = vand.u32 4294901760, %v42_v4 }
   0x8   :  { %34 = vperm.xlu0 %212, %v31_v3   ;;  %v61_v7 = vand.u32 4294901760, %v39_v5 }
   0x9   :  { %v86_v8 = vsub.f32 %v42_v4, %v59_v6  ;;  %60 = vmatpush.xpose.msra.mxu0 %v59_v6  ;;  %136 = vmatpush.xpose.msra.mxu3 %v59_v6 }
   0xa   :  { %v62_v9 = vsub.f32 %v39_v5, %v61_v7 }
   0xb   :  { %113 = vmatpush.xpose.msra.mxu2 %v86_v8  ;;  %v87_v10 = vand.u32 4294901760, %v86_v8 }
   0xc   :  { %v63_v11 = vand.u32 4294901760, %v62_v9 }
   0xd   :  { %v88_v12 = vsub.f32 %v86_v8, %v87_v10  ;;  %162 = vmatpush.xpose.msrb.mxu0 %v87_v10 }
   0xe   :  { %v64_v13 = vsub.f32 %v62_v9, %v63_v11  ;;  %140 = vmatmul.f32.vlgmr.msra.gmra.mxu3 %v63_v11  ;;  %116 = vmatmul.f32.vlgmr.msra.gmra.mxu2 %v62_v9 }
   0xf   :  { %v89_v14 = vand.u32 4294901760, %v88_v12 }
  0x10   :  { %v65_v15 = vand.u32 4294901760, %v64_v13 }
  0x11   :  { %90 = vmatpush.xpose.msra.mxu1 %v89_v14 }
  0x12   :  { %66 = vmatmul.f32.vlgmr.msra.gmra.mxu0 %v65_v15 }
  0x14   :  { %92 = vmatmul.f32.vlgmr.msra.gmra.mxu1 %v61_v7 }
  0x15   :  { %184 = vmatpush.xpose.msrb.mxu1 %v59_v6 }
  0x1a   :  { %164 = vmatmul.f32.vlgmr.msrb.gmra.mxu0 %v61_v7 }
  0x1c   :  { %186 = vmatmul.f32.vlgmr.msrb.gmra.mxu1 %v61_v7 }
  0x7a   :  { %v35_v16 = vpop.permute.xlu0 %34 }
  0x8f   :  { %v67_v17 = vpop.f32.mrf.mxu0 }
  0x90   :  { %v68_v18 = vadd.f32 %v67_v17, %v35_v16 }
  0x91   :  { %v93_v19 = vpop.f32.mrf.mxu1  ;;  %v117_v20 = vpop.f32.mrf.mxu2 }
  0x92   :  { %v94_v21 = vadd.f32 %v93_v19, %v68_v18  ;;  %v141_v22 = vpop.f32.mrf.mxu3 }
  0x94   :  { %v118_v23 = vadd.f32 %v117_v20, %v94_v21 }
  0x96   :  { %v142_v24 = vadd.f32 %v141_v22, %v118_v23 }
  0x97   :  { %v165_v25 = vpop.f32.mrf.mxu0 }
  0x98   :  { %v166_v26 = vadd.f32 %v165_v25, %v142_v24 }
  0x99   :  { %v187_v27 = vpop.f32.mrf.mxu1 }
  0x9a   :  { %v188_v28 = vadd.f32 %v187_v27, %v166_v26 }
  0x9c   :  { %191 = vst.msk [vmem:[#allocation5] sm:$0x3] %vm190_vm1, %v188_v28 }
  0x9d   :  { %202 = dma.vmem_to_hbm [thread:$0]  %s198_s1, 32, %s200_s22, [#allocation4]  }
  0x9e   :  { %263 = dma.done.wait [#allocation4], 32  }
  0x9f   :  { %264 = vsyncadd [#allocation4], 4294967264 }
  0xa0   :  { %207 = vsyncpa [#allocation3], 1 }
  0xa1   :  { %208 = vsyncpa [#allocation4], 1 }

</bundles_post_ra>
